<compile_context>
chip_gen: v6e
topology: v6e:2x2x1
jax: 0.10.0
libtpu: 0.0.40
codegen_flags: <defaults>
</compile_context>

<pallas_src>
import jax
import jax.numpy as jnp
from jax.experimental import pallas as pl
from jax.experimental.pallas import tpu as pltpu


# ----------------------------- Pallas kernel -------------------------------

def _conv_shift_kernel(x_ref, w_ref, sb_ref, o_ref):
    """Fused 3x3 SAME conv + (bias + pixel-wise shift) for B images.

    x_ref : (B, H+2*ph, (W+2*pw)*C_in)  zero-padded input rows, channels
                                        flattened into the lane dim (bf16)
    w_ref : (KH, (W+2*pw)*C_in, W*C_out) banded conv weight (grid-resident)
    sb_ref: (H, W*C_out)                pixel-wise shift + conv bias, f32
                                        (grid-resident, reused every step)
    o_ref : (B, H, W*C_out)             lane-dense output slab
    """
    B, H, Nout = o_ref.shape
    KH = w_ref.shape[0]
    Kin = x_ref.shape[2]

    x = x_ref[...]                                 # (B, Hp, Kin)
    acc = None
    for dh in range(KH):                           # static unroll over kernel rows
        # Fused im2col: the dh-th overlapping row window of every padded image,
        # leading dims collapsed so the MXU sees M = B*H; f32 accumulation.
        lhs = x[:, dh:dh + H, :].reshape(B * H, Kin)
        term = jnp.dot(lhs, w_ref[dh], preferred_element_type=jnp.float32)
        acc = term if acc is None else acc + term
    # Add (shift + bias), broadcast over the per-step image dim.
    out = acc.reshape(B, H, Nout) + sb_ref[...][None]
    o_ref[...] = out.astype(o_ref.dtype)


# --------------------- parameter preparation (hoisted) ----------------------

def prepare_deterministic_conditional_params(conv_w_oihw, conv_b, shift_chw=None,
                                             *, spatial_hw=None,
                                             compute_dtype=jnp.bfloat16):
    """Build the kernel-resident parameters ONCE per weight / shift update.

    conv_w_oihw: (C_out, C_in, KH, KW)   PyTorch Conv2d weight layout
    conv_b     : (C_out,)
    shift_chw  : (C_out, H, W) or None   pixel-wise shift (DeterministicConditional.shift)
    spatial_hw : (H, W), required only if shift_chw is None
    """
    C_out, C_in, KH, KW = conv_w_oihw.shape
    if shift_chw is not None:
        H, W = shift_chw.shape[1], shift_chw.shape[2]
    else:
        assert spatial_hw is not None, "need spatial_hw when shift is None"
        H, W = spatial_hw
    ph, pw = KH // 2, KW // 2
    Hp, Wp = H + 2 * ph, W + 2 * pw
    Kin, Nout = Wp * C_in, W * C_out

    # Banded weight: w_band[dh, (w+dw)*C_in + ci, w*C_out + co] = W[dh,dw,ci,co]
    w_hwio = jnp.transpose(conv_w_oihw, (2, 3, 1, 0))            # (KH, KW, C_in, C_out)
    dw_ar = jnp.arange(KW)[:, None, None]
    wp_ar = jnp.arange(Wp)[None, :, None]
    w_ar = jnp.arange(W)[None, None, :]
    onehot = (wp_ar == w_ar + dw_ar).astype(w_hwio.dtype)        # (KW, Wp, W)
    w_band = jnp.einsum('dpw,hdio->hpiwo', onehot, w_hwio)
    w_band = w_band.reshape(KH, Kin, Nout).astype(compute_dtype)

    # Pixel-wise shift with the conv bias folded in (f32, grid-resident).
    if shift_chw is not None:
        shift_hwc = jnp.transpose(shift_chw, (1, 2, 0))          # (H, W, C_out)
    else:
        shift_hwc = jnp.zeros((H, W, C_out), jnp.float32)
    sb = (shift_hwc + conv_b[None, None, :]).reshape(H, Nout).astype(jnp.float32)

    return dict(w_band=w_band, sb=sb, kh=KH, kw=KW, c_in=C_in, c_out=C_out,
                h=H, w=W, compute_dtype=compute_dtype)


# ------------------------------ forward wrappers -----------------------------

def deterministic_conditional_forward_nhwc(x_nhwc, params, *,
                                           out_dtype=jnp.float32,
                                           images_per_step=None):
    """output = Conv2d_SAME(x) + bias + shift, NHWC in / NHWC out."""
    N, H, W, C_in = x_nhwc.shape
    KH, KW = params['kh'], params['kw']
    C_out = params['c_out']
    compute_dtype = params['compute_dtype']
    assert (H, W, C_in) == (params['h'], params['w'], params['c_in'])

    ph, pw = KH // 2, KW // 2
    Hp, Wp = H + 2 * ph, W + 2 * pw
    Kin, Nout = Wp * C_in, W * C_out
    w_band, sb = params['w_band'], params['sb']

    # Choose the per-step image count B: amortize the ~0.35us/step grid
    # overhead, keep an even grid of >= 2 steps (both v7x TensorCores busy),
    # and cap double-buffered block VMEM so v5e's 16 MiB scoped default fits.
    if images_per_step is None:
        in_bytes = Hp * Kin * jnp.dtype(compute_dtype).itemsize
        out_bytes = H * Nout * jnp.dtype(out_dtype).itemsize
        per_image = 2 * (in_bytes + out_bytes)          # double-buffered in+out blocks
        budget = 6 * 1024 * 1024                        # conservative, portable
        b_cap = max(1, budget // per_image)
        steps = max(2, pl.cdiv(N, b_cap))
        steps += steps % 2                              # even grid length
        images_per_step = max(1, pl.cdiv(N, steps))
    B = int(images_per_step)
    G = pl.cdiv(N, B)
    Npad = G * B

    # Cast to compute dtype BEFORE padding; fuse batch + spatial padding into
    # one op; flatten (W, C_in) into the lane dimension.
    x_rows = jnp.pad(x_nhwc.astype(compute_dtype),
                     ((0, Npad - N), (ph, ph), (pw, pw), (0, 0)))
    x_rows = x_rows.reshape(Npad, Hp, Kin)
    # TODO(synk): padding could move in-kernel (memory_space=pl.ANY + manual
    # make_async_copy into a zeroed VMEM scratch) to remove this HBM round trip.

    out_rows = pl.pallas_call(
        _conv_shift_kernel,
        out_shape=jax.ShapeDtypeStruct((Npad, H, Nout), out_dtype),
        grid_spec=pltpu.PrefetchScalarGridSpec(
            num_scalar_prefetch=0,
            grid=(G,),
            in_specs=[
                pl.BlockSpec((B, Hp, Kin), lambda n: (n, 0, 0)),     # B padded images
                pl.BlockSpec((KH, Kin, Nout), lambda n: (0, 0, 0)),  # resident weight
                pl.BlockSpec((H, Nout), lambda n: (0, 0)),           # resident shift+bias
            ],
            out_specs=pl.BlockSpec((B, H, Nout), lambda n: (n, 0, 0)),
        ),
        compiler_params=pltpu.CompilerParams(
            dimension_semantics=("parallel",)),   # shardable across v7x's 2 TCs
    )(x_rows, w_band, sb)

    return out_rows[:N].reshape(N, H, W, C_out)


def deterministic_conditional_forward(x_nchw, params, *, out_dtype=jnp.float32,
                                      images_per_step=None):
    """PyTorch-layout wrapper (NCHW in / NCHW out).

    Prefer the NHWC entry point inside a real NHWC model to skip both
    layout transposes.
    """
    x_nhwc = jnp.transpose(x_nchw, (0, 2, 3, 1))
    out_nhwc = deterministic_conditional_forward_nhwc(
        x_nhwc, params, out_dtype=out_dtype, images_per_step=images_per_step)
    return jnp.transpose(out_nhwc, (0, 3, 1, 2))


# ------------------------------- main ---------------------------------------

if __name__ == "__main__":
    key = jax.random.PRNGKey(0)
    k_x, k_w, k_b, k_s = jax.random.split(key, 4)

    N, C_in, H, W = 2, 4, 16, 16
    C_out = 8
    compute_dtype = jnp.bfloat16   # bf16 MXU inputs, f32 accumulation

    x = jax.random.normal(k_x, (N, C_in, H, W), dtype=jnp.float32)
    conv_w = 0.1 * jax.random.normal(k_w, (C_out, C_in, 3, 3), dtype=jnp.float32)
    conv_b = 0.05 * jax.random.normal(k_b, (C_out,), dtype=jnp.float32)
    shift = 0.01 * jax.random.normal(k_s, (C_out, H, W), dtype=jnp.float32)

    # Weight-only transforms are hoisted: run once per weight/shift update.
    params = prepare_deterministic_conditional_params(
        conv_w, conv_b, shift, compute_dtype=compute_dtype)

    out = deterministic_conditional_forward(x, params, out_dtype=jnp.float32)
    out = jax.block_until_ready(out)

    # Pure-JAX reference: Conv2d (SAME, stride 1) + bias + pixel-wise shift.
    # Inputs/weights are rounded to the kernel's compute dtype so the only
    # remaining difference is f32 accumulation order. NOTE: against a true
    # f32 PyTorch module, use compute_dtype=jnp.float32 for bit-closer output.
    x_c = x.astype(compute_dtype).astype(jnp.float32)
    w_c = conv_w.astype(compute_dtype).astype(jnp.float32)
    ref = jax.lax.conv_general_dilated(
        x_c, w_c, window_strides=(1, 1), padding="SAME",
        dimension_numbers=("NCHW", "OIHW", "NCHW"))
    ref = ref + conv_b[None, :, None, None] + shift[None]

    assert out.shape == (N, C_out, H, W)
    assert jnp.allclose(out, ref, atol=5e-3, rtol=5e-3), "mismatch vs reference"

    # TODO(synk): `set_shift` is a host-side nn.Parameter mutation in PyTorch;
    # here it corresponds to re-running prepare_deterministic_conditional_params.

    print("KERNEL_OK")
</pallas_src>

<mosaic_0001>
module attributes {stable_mosaic.version = 11 : i64} {
  func.func @_conv_shift_kernel(%arg0: i32, %arg1: memref<1x18x72xbf16, #tpu.memory_space<vmem>>, %arg2: memref<3x72x128xbf16, #tpu.memory_space<vmem>>, %arg3: memref<16x128xf32, #tpu.memory_space<vmem>>, %arg4: memref<1x16x128xf32, #tpu.memory_space<vmem>>) attributes {dimension_semantics = [#tpu.dimension_semantics<parallel>], iteration_bounds = array<i64: 2>, scalar_prefetch = 0 : i64, scratch_operands = 0 : i64, tpu.core_type = #tpu.core_type<tc>, window_params = [{transform_indices = @transform_0, window_bounds = array<i64: 1, 18, 72>}, {pipeline_mode = #tpu.pipeline_mode<synchronous>, transform_indices = @transform_1, window_bounds = array<i64: 3, 72, 128>}, {pipeline_mode = #tpu.pipeline_mode<synchronous>, transform_indices = @transform_2, window_bounds = array<i64: 16, 128>}, {transform_indices = @transform_3, window_bounds = array<i64: 1, 16, 128>}]} {
    %c0 = arith.constant 0 : index
    %c0_0 = arith.constant 0 : index
    %c0_1 = arith.constant 0 : index
    %0 = vector.load %arg1[%c0, %c0_0, %c0_1] : memref<1x18x72xbf16, #tpu.memory_space<vmem>>, vector<1x18x72xbf16>
    %1 = vector.extract_strided_slice %0 {offsets = [0, 0, 0], sizes = [1, 16, 72], strides = [1, 1, 1]} : vector<1x18x72xbf16> to vector<1x16x72xbf16>
    %2 = vector.shape_cast %1 : vector<1x16x72xbf16> to vector<16x72xbf16>
    %c0_2 = arith.constant 0 : index
    %c0_3 = arith.constant 0 : index
    %c0_4 = arith.constant 0 : index
    %3 = vector.load %arg2[%c0_2, %c0_3, %c0_4] : memref<3x72x128xbf16, #tpu.memory_space<vmem>>, vector<1x72x128xbf16>
    %4 = vector.shape_cast %3 : vector<1x72x128xbf16> to vector<72x128xbf16>
    %cst = arith.constant dense<0.000000e+00> : vector<16x128xf32>
    %5 = tpu.matmul %2, %4, %cst {dimension_numbers = #tpu.dot_dimension_numbers<[1], [0], [0], [1], [0, 0, 1, 1], [], []>} : vector<16x72xbf16>, vector<72x128xbf16>, vector<16x128xf32> -> vector<16x128xf32>
    %6 = vector.extract_strided_slice %0 {offsets = [0, 1, 0], sizes = [1, 16, 72], strides = [1, 1, 1]} : vector<1x18x72xbf16> to vector<1x16x72xbf16>
    %7 = vector.shape_cast %6 : vector<1x16x72xbf16> to vector<16x72xbf16>
    %c1 = arith.constant 1 : index
    %c0_5 = arith.constant 0 : index
    %c0_6 = arith.constant 0 : index
    %8 = vector.load %arg2[%c1, %c0_5, %c0_6] : memref<3x72x128xbf16, #tpu.memory_space<vmem>>, vector<1x72x128xbf16>
    %9 = vector.shape_cast %8 : vector<1x72x128xbf16> to vector<72x128xbf16>
    %cst_7 = arith.constant dense<0.000000e+00> : vector<16x128xf32>
    %10 = tpu.matmul %7, %9, %cst_7 {dimension_numbers = #tpu.dot_dimension_numbers<[1], [0], [0], [1], [0, 0, 1, 1], [], []>} : vector<16x72xbf16>, vector<72x128xbf16>, vector<16x128xf32> -> vector<16x128xf32>
    %11 = arith.addf %5, %10 : vector<16x128xf32>
    %12 = vector.extract_strided_slice %0 {offsets = [0, 2, 0], sizes = [1, 16, 72], strides = [1, 1, 1]} : vector<1x18x72xbf16> to vector<1x16x72xbf16>
    %13 = vector.shape_cast %12 : vector<1x16x72xbf16> to vector<16x72xbf16>
    %c2 = arith.constant 2 : index
    %c0_8 = arith.constant 0 : index
    %c0_9 = arith.constant 0 : index
    %14 = vector.load %arg2[%c2, %c0_8, %c0_9] : memref<3x72x128xbf16, #tpu.memory_space<vmem>>, vector<1x72x128xbf16>
    %15 = vector.shape_cast %14 : vector<1x72x128xbf16> to vector<72x128xbf16>
    %cst_10 = arith.constant dense<0.000000e+00> : vector<16x128xf32>
    %16 = tpu.matmul %13, %15, %cst_10 {dimension_numbers = #tpu.dot_dimension_numbers<[1], [0], [0], [1], [0, 0, 1, 1], [], []>} : vector<16x72xbf16>, vector<72x128xbf16>, vector<16x128xf32> -> vector<16x128xf32>
    %17 = arith.addf %11, %16 : vector<16x128xf32>
    %18 = vector.shape_cast %17 : vector<16x128xf32> to vector<1x16x128xf32>
    %c0_11 = arith.constant 0 : index
    %c0_12 = arith.constant 0 : index
    %19 = vector.load %arg3[%c0_11, %c0_12] : memref<16x128xf32, #tpu.memory_space<vmem>>, vector<16x128xf32>
    %20 = vector.shape_cast %19 : vector<16x128xf32> to vector<1x16x128xf32>
    %21 = arith.addf %18, %20 : vector<1x16x128xf32>
    %c0_13 = arith.constant 0 : index
    %c0_14 = arith.constant 0 : index
    %c0_15 = arith.constant 0 : index
    %22 = vector.load %arg4[%c0_13, %c0_14, %c0_15] : memref<1x16x128xf32, #tpu.memory_space<vmem>>, vector<1x16x128xf32>
    tpu.vector_store %arg4[%c0_13, %c0_14, %c0_15], %21 {strides = array<i32>} : memref<1x16x128xf32, #tpu.memory_space<vmem>>, vector<1x16x128xf32>,
    return
  }
  func.func @transform_0(%arg0: i32) -> (i32, i32, i32) {
    %c0_i32 = arith.constant 0 : i32
    %c0_i32_0 = arith.constant 0 : i32
    %c0_i32_1 = arith.constant 0 : i32
    return %arg0, %c0_i32, %c0_i32_0 : i32, i32, i32
  }
  func.func @transform_1(%arg0: i32) -> (i32, i32, i32) {
    %c0_i32 = arith.constant 0 : i32
    %c0_i32_0 = arith.constant 0 : i32
    %c0_i32_1 = arith.constant 0 : i32
    %c0_i32_2 = arith.constant 0 : i32
    return %c0_i32, %c0_i32_0, %c0_i32_1 : i32, i32, i32
  }
  func.func @transform_2(%arg0: i32) -> (i32, i32) {
    %c0_i32 = arith.constant 0 : i32
    %c0_i32_0 = arith.constant 0 : i32
    %c0_i32_1 = arith.constant 0 : i32
    return %c0_i32, %c0_i32_0 : i32, i32
  }
  func.func @transform_3(%arg0: i32) -> (i32, i32, i32) {
    %c0_i32 = arith.constant 0 : i32
    %c0_i32_0 = arith.constant 0 : i32
    %c0_i32_1 = arith.constant 0 : i32
    return %arg0, %c0_i32, %c0_i32_0 : i32, i32, i32
  }
}

</mosaic_0001>

<bundles_post_ra>
// kernel: tpu_custom_call.1
= control target key start
LH: loop header
LB: loop body
LE: loop exit
PB: predicated region body
PF: predicated region fallthrough
CT: control target
= control target key end

     0   :  { %8 = vsyncpa [#allocation3], 0  ;;  %s1002_s0 = inlined_call_operand.vmem [shape: bf16[2,18,72], index: 0, kind: input, shape index: {}]   ;;  %s1003_s1 = inlined_call_operand.hbm [shape: bf16[3,72,128], index: 1, kind: input, shape index: {}]   ;;  %s1004_s2 = inlined_call_operand.vmem [shape: f32[16,128], index: 2, kind: input, shape index: {}]   ;;  %s1005_s3 = inlined_call_operand.hbm [shape: f32[2,16,128], index: 3, kind: output, shape index: {}]  }
   0x1   :  { %9 = vsyncpa [#allocation4], 0 }
   0x2   :  { %11 = vsyncpa [#allocation4 + $0x1], 0  ;;  %s849_s12 = smov 0   ;;  %s851_s13 = smov 0  }
   0x3   :  { %s853_s14 = smov 0   ;;  %s855_s15 = smov 0  }
   0x4 LB: > { %s870_s16 = sadd.s32 4294967295, %s819_s15   ;;  %s561_s17 = sadd.s32 4294967294, %s819_s15   ;;  %s819_s15 = sphi %s855_s15, %s1013_s15   ;;  %s815_s14 = sphi %s853_s14, %s1012_s14   ;;  %s811_s13 = sphi %s851_s13, %s1011_s13   ;;  %s807_s12 = sphi %s849_s12, %s1010_s12  }
   0x5   : > { %s874_s18 = sadd.s32 1, %s819_s15   ;;  %s92_s19 = sadd.s32 1, %s815_s14 }
   0x6   : > { %s89_s20 = ssub.s32 %s819_s15, %s874_s18  ;;  %p102_p0 = scmp.ne.s32.totalorder %s815_s14, %s811_s13 }
   0x7   : > { %p90_p1 = scmp.eq.s32.totalorder %s89_s20, 0  ;;  %p103_p2 = scmp.eq.s32.totalorder %s870_s16, 1 }
   0x8   : > { %p108_p3 = scmp.ne.s32.totalorder %s811_s13, %s807_s12  ;;  %p109_p4 = scmp.eq.s32.totalorder %s561_s17, 1 }
   0x9   : > { %s885_s21 = scalar_select %p90_p1, %s815_s14, %s92_s19  }
   0xa   : > { %p887_p5 = por %p103_p2, %p102_p0  ;;  %p891_p6 = por %p109_p4, %p108_p3 }
   0xb   : > { %p562_p7 = scmp.ge.s32.totalorder %s819_s15, 1  ;;  %p116_p8 = scmp.lt.s32.totalorder %s819_s15, 3 }
   0xc   : > { %s1007_s23 = scalar_select %p891_p6, 1, 0 }
   0xd   : > { %p670_p9 = scmp.eq.s32.totalorder %s870_s16, 0  ;;  %p898_p10 = pnand %p562_p7, %p116_p8 }
   0xe   : > { %s821_s25 = smov [#allocation2]  }
   0xf   : > { %s128_s26 = sshll.u32 %s821_s25, 4  ;;  %p662_p11 = pneg %p898_p10  ;;  %s129_s26 = int_to_ptr.vmem [resolvable:$true] %s128_s26 }
  0x10   : > { %s740_s27 = scalar_lea.vmem %s129_s26, 1728  ;;  %p748_p3 = scmp.lt.s32.totalorder %s129_s26, %s129_s26 }
  0x11   : > { %p663_p12 = pnand %p670_p9, %p662_p11  ;;  %p741_p0 = scmp.ne.s32.totalorder %s129_s26, %s740_s27 }
  0x12   : > { %p749_p4 = scmp.lt.s32.totalorder %s740_s27, %s740_s27 }
  0x13   : > { %p731_p13 = pneg %p663_p12 }
  0x14   : > { %p750_p6 = por %p749_p4, %p748_p3 }
  0x15   : > { %p743_p1 = pnand %p741_p0, %p731_p13 }
  0x17   : > { %p744_p2 = pneg %p743_p1 }
  0x19   : > { %p751_p7 = pnand %p750_p6, %p744_p2 }
  0x1b   : > { %754 = shalt.err (!%p751_p7)
}
  0x1c   : > { %s822_s28 = smov 64   ;;  %s823_s29 = smov 4  }
  0x1d   : > { %665 = dma.hbm_to_vmem [thread:$0]  (!%p663_p12), %s1003_s1, 1728, %s129_s26, [#allocation3], %s822_s28, %s822_s28, %s823_s29  }
  0x1e   : > { %155 = sbr.rel (%p898_p10) target bundleno = 293 (0x125), region = 32 }
  0x23   : > { %798 = dma.done.wait (%p670_p9), [#allocation3], 1728  }
  0x24   : > { %800 = vsyncadd (%p670_p9), [#allocation3], 4294965568  ;;  %v824_v0 = vmov 0.0   ;;  %p179_p6 = scmp.lt.s32.totalorder %s870_s16, 1  ;;  %vm825_vm0 = vmmov 0   ;;  %vm259_vm1 = vcmask 1043456  }
  0x25   : > { %613 = vmatprep.subr.bf16.mxu0 %v824_v0  ;;  %627 = vmatprep.subr.bf16.mxu1 %v824_v0  ;;  %v712_v1 = vld [vmem:[#allocation2 + $0x44] ss:$0 sps:$4 sm:$0xff]   ;;  %v713_v2 = vld [vmem:[#allocation2 + $0x20] ss:$0 sps:$4 sm:$0xff]   ;;  %v715_v6 = vld [vmem:[#allocation2 + $0x18] sm:$0xff]   ;;  %vm255_vm3 = vcmask 588800  }
  0x26   : > { %623 = vmatprep.mubr.msk.bf16.mxu0 %vm825_vm0, %v824_v0  ;;  %637 = vmatprep.mubr.msk.bf16.mxu1 %vm825_vm0, %v824_v0  ;;  %s180_s5 = scalar_select %p179_p6, %s870_s16, 1  ;;  %v261_v3 = vsel %vm259_vm1, %v712_v1, 0  ;;  %v334_v4 = vsel %vm259_vm1, %v713_v2, 0  ;;  %v714_v5 = vld [vmem:[#allocation2 + $0x3c] sm:$0xff]   ;;  %v716_v7 = vld [vmem:[#allocation2 + $0x34] sm:$0xff]   ;;  %v718_v11 = vld [vmem:[#allocation2 + $0x2c] sm:$0xff]  }
  0x27   : > { %614 = vmatpush3.bf16.msra.mxu0 %v261_v3  ;;  %628 = vmatpush3.bf16.msra.mxu1 %v334_v4  ;;  %v717_v8 = vld [vmem:[#allocation2 + $0x10] sm:$0xff]   ;;  %v719_v12 = vld [vmem:[#allocation2 + $0x8] sm:$0xff]   ;;  %v721_v19 = vld [vmem:[#allocation2] sm:$0xff]   ;;  %vm215_vm2 = vsmask.f32 7424  ;;  %vm387_vm4 = vcmask 1046528  }
  0x28   : > { %s655_s6 = smul.u32 12, %s180_s5  ;;  %615 = vmatprep.subr.bf16.mxu0 %v824_v0  ;;  %629 = vmatprep.subr.bf16.mxu1 %v824_v0  ;;  %v720_v17 = vld [vmem:[#allocation2 + $0x24] sm:$0xff]   ;;  %v726_v25 = vld [vmem:[#allocation2 + $0x58] sm:$0xff]   ;;  %v727_v26 = vld [vmem:[#allocation2 + $0x50] sm:$0xff]   ;;  %s176_s10 = sand.u32 1, %s811_s13  }
  0x29   : > { %v724_v21 = vld [vmem:[#allocation2 + $0x68] ss:$0 sps:$4 sm:$0xff]   ;;  %v725_v24 = vld [vmem:[#allocation2 + $0x60] sm:$0xff]   ;;  %s567_s11 = sshll.u32 %s176_s10, 4  ;;  %s594_s27 = sshll.u32 %s870_s16, 8 }
  0x2a   : > { %s183_s9 = scalar_lea.vmem %s1002_s0, %s655_s6  ;;  %v422_v23 = vsel %vm259_vm1, %v724_v21, 0  ;;  %v728_v27 = vld [vmem:[#allocation2 + $0x48] sm:$0xff]   ;;  %v467_v41 = vld [vmem:[%s1004_s2] sm:$0xff]  ;;  %s178_s20 = scalar_lea.vmem [#allocation5], %s567_s11 }
  0x2b   : > { %616 = vmatpush3.bf16.msra.mxu0 %v714_v5  ;;  %630 = vmatpush3.bf16.msra.mxu1 %v715_v6  ;;  %v722_v9 = vld [vmem:[%s183_s9] sm:$0xff]   ;;  %v723_v10 = vld [vmem:[%s183_s9 + $0x8] ss:$0 sps:$4 sm:$0x11]   ;;  %s487_s24 = sshll.u32 %s178_s20, 4  ;;  %s960_s30 = scalar_lea.hbm %s1005_s3, %s594_s27  ;;  %s955_s24 = int_to_ptr.vmem [resolvable:$true] %s487_s24 }
  0x2c   : > { %617 = vmatprep.subr.bf16.mxu0 %v824_v0  ;;  %631 = vmatprep.subr.bf16.mxu1 %v824_v0  ;;  %v217_v13 = vshrl.u32 %v722_v9, 16  ;;  %v219_v14 = vshll.u32 %v722_v9, 16  ;;  %v224_v15 = vshll.u32 %v723_v10, 16  ;;  %v388_v28 = vrot.slane %v722_v9, 1  ;;  %v468_v47 = vld [vmem:[%s1004_s2 + $0x8] sm:$0xff]  ;;  %s962_s4 = scalar_lea.sflag [#allocation4], %s176_s10 }
  0x2d   : > { %v389_v29 = vrot.slane %v723_v10, 1  ;;  %s755_s5 = scalar_lea.vmem %s955_s24, 256  ;;  %s826_s16 = smov [#allocation5]  }
  0x2e   : > { %v221_v16 = vrot.slane %v219_v14, 1  ;;  %v226_v18 = vrot.slane %v224_v15, 1  ;;  %p756_p8 = scmp.ne.s32.totalorder %s955_s24, %s755_s5  ;;  %s759_s6 = sshll.u32 %s826_s16, 4  ;;  %s760_s6 = int_to_ptr.vmem [resolvable:$false] %s759_s6 }
  0x2f   : > { %618 = vmatpush3.bf16.msra.mxu0 %v716_v7  ;;  %632 = vmatpush3.bf16.msra.mxu1 %v717_v8  ;;  %v390_v30 = vsel %vm387_vm4, %v388_v28, %v389_v29  ;;  %s761_s7 = scalar_lea.vmem %s760_s6, 512  ;;  %p762_p11 = scmp.lt.s32.totalorder %s955_s24, %s760_s6 }
  0x30   : > { %619 = vmatprep.subr.bf16.mxu0 %v824_v0  ;;  %633 = vmatprep.subr.bf16.mxu1 %v824_v0  ;;  %v222_v20 = vor.u32 %v221_v16, %v217_v13  ;;  %p757_p9 = pnand %p756_p8, %p887_p5  ;;  %p763_p12 = scmp.lt.s32.totalorder %s761_s7, %s755_s5 }
  0x32   : > { %v227_v22 = vsel %vm215_vm2, %v222_v20, %v226_v18  ;;  %p758_p10 = pneg %p757_p9  ;;  %p764_p13 = por %p763_p12, %p762_p11 }
  0x33   : > { %620 = vmatpush3.bf16.msra.mxu0 %v718_v11  ;;  %634 = vmatpush3.bf16.msra.mxu1 %v719_v12 }
  0x34   : > { %621 = vmatprep.subr.bf16.mxu0 %v824_v0  ;;  %635 = vmatprep.subr.bf16.mxu1 %v824_v0  ;;  %p765_p0 = pnand %p764_p13, %p758_p10 }
  0x37   : > { %622 = vmatpush3.bf16.msra.mxu0 %v720_v17  ;;  %636 = vmatpush3.bf16.msra.mxu1 %v721_v19 }
  0x38   : > { %641 = vmatprep.subr.bf16.mxu0 %v824_v0 }
  0x3a   : > { %624 = vmatmul.mubr.msk.bf16.vlgmr.msra.gmra.mxu0 %vm255_vm3, %v227_v22  ;;  %638 = vmatmul.mubr.msk.bf16.vlgmr.msra.gmra.mxu1 %vm255_vm3, %v722_v9 }
  0x3b   : > { %642 = vmatpush3.bf16.msra.mxu0 %v422_v23  ;;  %651 = vmatprep.mubr.msk.bf16.mxu0 %vm825_vm0, %v824_v0 }
  0x3c   : > { %643 = vmatprep.subr.bf16.mxu0 %v824_v0 }
  0x3f   : > { %644 = vmatpush3.bf16.msra.mxu0 %v725_v24 }
  0x40   : > { %645 = vmatprep.subr.bf16.mxu0 %v824_v0 }
  0x43   : > { %646 = vmatpush3.bf16.msra.mxu0 %v726_v25 }
  0x44   : > { %647 = vmatprep.subr.bf16.mxu0 %v824_v0 }
  0x47   : > { %648 = vmatpush3.bf16.msra.mxu0 %v727_v26 }
  0x48   : > { %649 = vmatprep.subr.bf16.mxu0 %v824_v0 }
  0x4b   : > { %650 = vmatpush3.bf16.msra.mxu0 %v728_v27 }
  0x4e   : > { %652 = vmatmul.mubr.msk.bf16.vlgmr.msra.gmra.mxu0 %vm255_vm3, %v390_v30 }
  0xfa   : > { %v297_v31 = vpop.f32.mrf.mxu0  ;;  %v370_v32 = vpop.f32.mrf.mxu1 }
  0xfb   : > { %v371_v39 = vadd.f32 %v370_v32, %v297_v31 }
  0xfc   : > { %v625_v33 = vpop.f32.mrf.mxu0  ;;  %v639_v34 = vpop.f32.mrf.mxu1 }
  0xfe   : > { %v300_v35 = vpop.f32.mrf.mxu0  ;;  %v373_v36 = vpop.f32.mrf.mxu1 }
  0xff   : > { %v374_v44 = vadd.f32 %v373_v36, %v300_v35 }
 0x100   : > { %v626_v37 = vpop.f32.mrf.mxu0  ;;  %v640_v38 = vpop.f32.mrf.mxu1 }
 0x10e   : > { %v458_v40 = vpop.f32.mrf.mxu0 }
 0x10f   : > { %v465_v42 = vadd.f32 %v458_v40, %v371_v39 }
 0x110   : > { %v653_v43 = vpop.f32.mrf.mxu0 }
 0x111   : > { %v469_v45 = vadd.f32 %v467_v41, %v465_v42 }
 0x112   : > { %v461_v46 = vpop.f32.mrf.mxu0 }
 0x113   : > { %471 = vst [vmem:[%s178_s20] sm:$0xff] %v469_v45  ;;  %v466_v48 = vadd.f32 %v461_v46, %v374_v44 }
 0x114   : > { %v654_v49 = vpop.f32.mrf.mxu0 }
 0x115   : > { %v470_v50 = vadd.f32 %v468_v47, %v466_v48 }
 0x117   : > { %472 = vst [vmem:[%s178_s20 + $0x8] sm:$0xff] %v470_v50 }
 0x118   : > { %768 = shalt.err (!%p765_p0)
}
 0x119   : > { %s769_s8 = scalar_lea.hbm %s960_s30, 256  ;;  %s773_s11 = scalar_lea.hbm %s1005_s3, 512 }
 0x11a   : > { %p770_p1 = scmp.ne.s32.totalorder %s960_s30, %s769_s8  ;;  %p774_p4 = scmp.lt.s32.totalorder %s960_s30, %s1005_s3 }
 0x11b   : > { %p775_p7 = scmp.lt.s32.totalorder %s773_s11, %s769_s8 }
 0x11c   : > { %p771_p2 = pnand %p770_p1, %p887_p5 }
 0x11d   : > { %p776_p6 = por %p775_p7, %p774_p4 }
 0x11e   : > { %p772_p3 = pneg %p771_p2 }
 0x120   : > { %p777_p8 = pnand %p776_p6, %p772_p3 }
 0x122   : > { %780 = shalt.err (!%p777_p8)
}
 0x123   : > { %s827_s20 = smov 128   ;;  %s828_s25 = smov 8  }
 0x124   : > { %660 = dma.vmem_to_hbm [thread:$0]  (%p887_p5), %s955_s24, 256, %s960_s30, %s962_s4, %s827_s20, %s827_s20, %s828_s25  }
 0x125 PF: > { %p672_p9 = scmp.ge.s32.totalorder %s819_s15, 2  ;;  %s502_s26 = sand.u32 1, %s807_s12  }
 0x126   : > { %p1009_p10 = scmp.ne.s32.totalorder %s1007_s23, 0  ;;  %s503_s27 = scalar_lea.sflag [#allocation4], %s502_s26 }
 0x128   : > { %p667_p11 = pnand %p672_p9, %p1009_p10 }
 0x12a   : > { %p668_p12 = pneg %p667_p11 }
 0x12c   : > { %802 = dma.done.wait (%p668_p12), %s503_s27, 256  }
 0x12d   : > { %804 = vsyncadd (%p668_p12), %s503_s27, 4294967040  ;;  %p14_p13 = scmp.ge.s32.totalorder %s874_s18, 4   ;;  %s1010_s12 = smov %s811_s13 }
 0x12e   : > { %s1011_s13 = smov %s815_s14  ;;  %s1012_s14 = smov %s885_s21 }
 0x12f   : > { %s1013_s15 = smov %s874_s18  ;;  %16 = sbr.rel (!%p14_p13) target bundleno = 4 (0x4), region = 74 }
 0x134   :  { %508 = vsyncpa [#allocation3], 1 }
 0x135   :  { %510 = vsyncpa [#allocation3 + $0x1], 1 }
 0x136   :  { %511 = vsyncpa [#allocation4], 1 }
 0x137   :  { %513 = vsyncpa [#allocation4 + $0x1], 1 }

</bundles_post_ra>
